<compile_context>
chip_gen: v5e
topology: v5e:2x2
jax: 0.10.0
libtpu: 0.0.40
codegen_flags: <defaults>
</compile_context>

<pallas_src>
import jax
import jax.numpy as jnp
from jax.experimental import pallas as pl
from jax.experimental.pallas import tpu as pltpu


def _layer_scale_kernel(x_ref, gamma_ref, o_ref):
    # x_ref: (tm, Dw) tile; gamma_ref: (1, Dw) resident row; VPU broadcast multiply.
    o_ref[...] = x_ref[...] * gamma_ref[...]


def _round_up(n, m):
    return ((n + m - 1) // m) * m


def _pick_row_tile(n_rows, lane_width, dtype_bytes, target_block_bytes):
    """Largest multiple-of-8 row tile whose (tm, lane_width) block fits the
    budget; prefer an exact divisor of n_rows (no padding) if one exists within
    2x of the cap, otherwise pad the remainder in the wrapper."""
    tm_cap = max(8, (target_block_bytes // (lane_width * dtype_bytes)) // 8 * 8)
    if n_rows <= tm_cap:
        return _round_up(n_rows, 8)
    lo = max(8, tm_cap // 2)
    for tm in range(tm_cap, lo - 1, -8):
        if n_rows % tm == 0:
            return tm
    return tm_cap


def layer_scale(x: jax.Array, gamma: jax.Array, *,
                target_block_bytes: int = 2 << 20,
                donate: bool = False) -> jax.Array:
    """LayerScale forward: x * gamma, broadcasting gamma over the last dim.

    x: (..., D), gamma: (D,). `donate=True` aliases the (possibly padded/folded)
    input buffer to the output (PyTorch `inplace=True` analogue); caller must not
    reuse x afterwards.
    """
    orig_shape = x.shape
    D = orig_shape[-1]
    assert gamma.shape == (D,), f"gamma must have shape ({D},), got {gamma.shape}"
    dtype_bytes = jnp.dtype(x.dtype).itemsize

    x2d = x.reshape(-1, D)
    M = x2d.shape[0]

    # Lane-dense folding: if D < 128 and divides 128, fold k rows into lanes so
    # the kernel's last dim is exactly a multiple of 128.
    # TODO(synk): D < 128 that does not divide 128 is left un-folded (masked stores).
    k = 128 // D if (D < 128 and 128 % D == 0) else 1
    Dw = k * D

    n_rows = pl.cdiv(M, k)
    tm = _pick_row_tile(n_rows, Dw, dtype_bytes, target_block_bytes)
    n_rows_p = _round_up(n_rows, tm)
    m_total = n_rows_p * k

    if m_total != M:
        x2d = jnp.pad(x2d, ((0, m_total - M), (0, 0)))
    x_fold = x2d.reshape(n_rows_p, Dw)

    gamma_row = jnp.tile(gamma.astype(x.dtype), k).reshape(1, Dw)

    grid = (n_rows_p // tm,)
    cost = pl.CostEstimate(
        flops=M * D,
        transcendentals=0,
        bytes_accessed=2 * M * D * dtype_bytes + D * dtype_bytes,
    )

    out = pl.pallas_call(
        _layer_scale_kernel,
        out_shape=jax.ShapeDtypeStruct((n_rows_p, Dw), x.dtype),
        grid_spec=pltpu.PrefetchScalarGridSpec(
            num_scalar_prefetch=0,
            grid=grid,
            in_specs=[
                pl.BlockSpec((tm, Dw), lambda i: (i, 0)),
                pl.BlockSpec((1, Dw), lambda i: (0, 0)),   # constant block: stays resident
            ],
            out_specs=pl.BlockSpec((tm, Dw), lambda i: (i, 0)),
        ),
        compiler_params=pltpu.CompilerParams(
            dimension_semantics=("parallel",),
        ),
        cost_estimate=cost,
        input_output_aliases={0: 0} if donate else {},
    )(x_fold, gamma_row)

    out = out.reshape(m_total, D)
    if m_total != M:
        out = out[:M]
    return out.reshape(orig_shape)


if __name__ == "__main__":
    key = jax.random.PRNGKey(0)

    # Shapes implied by LayerScale in a ViT block: (batch, tokens, dim)
    B, N, D = 2, 8, 32
    init_values = 1e-5

    x = jax.random.normal(key, (B, N, D), dtype=jnp.float32)
    # nn.Parameter(init_values * torch.ones(dim))
    gamma = jnp.full((D,), init_values, dtype=jnp.float32)

    y = layer_scale(x, gamma)
    jax.block_until_ready(y)
    y_ref = x * gamma
    assert y.shape == x.shape
    assert jnp.allclose(y, y_ref, atol=1e-7, rtol=1e-6)

    # Extra check: non-divisible row count, D >= 128 (exercises padding path).
    k2 = jax.random.PRNGKey(1)
    x2 = jax.random.normal(k2, (2, 5, 192), dtype=jnp.float32)
    g2 = jnp.full((192,), init_values, dtype=jnp.float32)
    y2 = layer_scale(x2, g2)
    jax.block_until_ready(y2)
    assert jnp.allclose(y2, x2 * g2, atol=1e-7, rtol=1e-6)

    print("KERNEL_OK")
</pallas_src>

<mosaic_0001>
module attributes {stable_mosaic.version = 11 : i64} {
  func.func @_layer_scale_kernel(%arg0: i32, %arg1: memref<8x128xf32, #tpu.memory_space<vmem>>, %arg2: memref<1x128xf32, #tpu.memory_space<vmem>>, %arg3: memref<8x128xf32, #tpu.memory_space<vmem>>) attributes {dimension_semantics = [#tpu.dimension_semantics<parallel>], iteration_bounds = array<i64: 1>, scalar_prefetch = 0 : i64, scratch_operands = 0 : i64, tpu.core_type = #tpu.core_type<tc>, window_params = [{transform_indices = @transform_0, window_bounds = array<i64: 8, 128>}, {pipeline_mode = #tpu.pipeline_mode<synchronous>, transform_indices = @transform_1, window_bounds = array<i64: 1, 128>}, {transform_indices = @transform_2, window_bounds = array<i64: 8, 128>}]} {
    %c0 = arith.constant 0 : index
    %c0_0 = arith.constant 0 : index
    %0 = vector.load %arg1[%c0, %c0_0] : memref<8x128xf32, #tpu.memory_space<vmem>>, vector<8x128xf32>
    %c0_1 = arith.constant 0 : index
    %c0_2 = arith.constant 0 : index
    %1 = vector.load %arg2[%c0_1, %c0_2] : memref<1x128xf32, #tpu.memory_space<vmem>>, vector<1x128xf32>
    %2 = vector.broadcast %1 : vector<1x128xf32> to vector<8x128xf32>
    %3 = arith.mulf %0, %2 : vector<8x128xf32>
    %c0_3 = arith.constant 0 : index
    %c0_4 = arith.constant 0 : index
    %4 = vector.load %arg3[%c0_3, %c0_4] : memref<8x128xf32, #tpu.memory_space<vmem>>, vector<8x128xf32>
    tpu.vector_store %arg3[%c0_3, %c0_4], %3 {strides = array<i32>} : memref<8x128xf32, #tpu.memory_space<vmem>>, vector<8x128xf32>,
    return
  }
  func.func @transform_0(%arg0: i32) -> (i32, i32) {
    %c0_i32 = arith.constant 0 : i32
    %c0_i32_0 = arith.constant 0 : i32
    return %arg0, %c0_i32 : i32, i32
  }
  func.func @transform_1(%arg0: i32) -> (i32, i32) {
    %c0_i32 = arith.constant 0 : i32
    %c0_i32_0 = arith.constant 0 : i32
    %c0_i32_1 = arith.constant 0 : i32
    return %c0_i32, %c0_i32_0 : i32, i32
  }
  func.func @transform_2(%arg0: i32) -> (i32, i32) {
    %c0_i32 = arith.constant 0 : i32
    %c0_i32_0 = arith.constant 0 : i32
    return %arg0, %c0_i32 : i32, i32
  }
}

</mosaic_0001>

<bundles_post_ra>
// kernel: tpu_custom_call.1
= control target key start
LH: loop header
LB: loop body
LE: loop exit
PB: predicated region body
PF: predicated region fallthrough
CT: control target
= control target key end

     0   :  { %7 = vsyncpa [#allocation3], 0  ;;  %s174_s0 = inlined_call_operand.hbm [shape: f32[8,128], index: 0, kind: input, shape index: {}]   ;;  %s175_s1 = inlined_call_operand.hbm [shape: f32[1,128], index: 1, kind: input, shape index: {}]   ;;  %s176_s2 = inlined_call_operand.hbm [shape: f32[8,128], index: 2, kind: output, shape index: {}]  }
   0x1   :  { %8 = vsyncpa [#allocation6], 0 }
   0x2   :  { %9 = vsyncpa [#allocation4], 0  ;;  %s15_s11 = sshll.u32 %s174_s0, 4  ;;  %s147_s12 = smov [#allocation2]   ;;  %s16_s11 = int_to_ptr.hbm [resolvable:$true] %s15_s11 }
   0x3   :  { %s17_s13 = sshll.u32 %s147_s12, 4  ;;  %s26_s16 = sshll.u32 %s175_s1, 4  ;;  %s18_s13 = int_to_ptr.vmem [resolvable:$true] %s17_s13  ;;  %s27_s16 = int_to_ptr.hbm [resolvable:$true] %s26_s16 }
   0x4   :  { %20 = dma.hbm_to_vmem [thread:$0]  %s16_s11, 128, %s18_s13, [#allocation3]  }
   0x5   :  { %s148_s17 = smov [#allocation5]  }
   0x6   :  { %s28_s18 = sshll.u32 %s148_s17, 4  ;;  %s29_s18 = int_to_ptr.vmem [resolvable:$true] %s28_s18 }
   0x7   :  { %31 = dma.hbm_to_vmem [thread:$0]  %s27_s16, 16, %s29_s18, [#allocation6]  }
   0x8   :  { %141 = dma.done.wait [#allocation3], 128  }
   0x9   :  { %142 = vsyncadd [#allocation3], 4294967168 }
   0xa   :  { %143 = dma.done.wait [#allocation6], 16  }
   0xb   :  { %144 = vsyncadd [#allocation6], 4294967280  ;;  %s149_s19 = smov [#allocation7]   ;;  %s54_s22 = sshll.u32 %s176_s2, 4  ;;  %v40_v0 = vld [vmem:[#allocation2] sm:$0xff]  ;;  %s55_s22 = int_to_ptr.hbm [resolvable:$true] %s54_s22 }
   0xc   :  { %s52_s0 = sshll.u32 %s149_s19, 4  ;;  %v68_v1 = vld [vmem:[#allocation5] ss:$0 sm:$0xff]  ;;  %s53_s0 = int_to_ptr.vmem [resolvable:$true] %s52_s0 }
   0xd   :  { %v45_v2 = vmul.f32 %v68_v1, %v40_v0 }
   0xf   :  { %46 = vst [vmem:[#allocation7] sm:$0xff] %v45_v2 }
  0x10   :  { %57 = dma.vmem_to_hbm [thread:$0]  %s53_s0, 128, %s55_s22, [#allocation4]  }
  0x11   :  { %145 = dma.done.wait [#allocation4], 128  }
  0x12   :  { %146 = vsyncadd [#allocation4], 4294967168 }
  0x13   :  { %62 = vsyncpa [#allocation3], 1 }
  0x14   :  { %63 = vsyncpa [#allocation6], 1 }
  0x15   :  { %64 = vsyncpa [#allocation4], 1 }

</bundles_post_ra>
